<compile_context>
chip_gen: v6e
topology: v6e:2x2x1
jax: 0.10.0
libtpu: 0.0.40
codegen_flags: <defaults>
</compile_context>

<pallas_src>
import functools
import math

import jax
import jax.numpy as jnp
from jax import lax
from jax.experimental import pallas as pl
from jax.experimental.pallas import tpu as pltpu


def _convnet_kernel(*args, stage_dims, userelu_flags):
    """Fused ConvNet forward for ONE image (grid is over the batch).

    Layout: channels-first, spatial flattened on the lane axis.
      args[0]            x_ref     (1, Cin0, H0*W0)          f32
      args[1+3s]         w_ref[s]  (Cout_s, 9*Cin_s)         f32  BN-folded, (ky,kx,cin) order
      args[2+3s]         b_ref[s]  (Cout_s, 1)               f32  BN effective bias
      args[3+3s]         s_ref[s]  (H_s*W_s, H_s*W_s/4)      f32  0/1 pool-compression matrix
      args[1+3S]         o_ref     (1, 1, Cf*Hf*Wf)               torch NCHW-flatten order
    """
    num_stages = len(stage_dims)
    x_ref = args[0]
    w_refs = [args[1 + 3 * s] for s in range(num_stages)]
    b_refs = [args[2 + 3 * s] for s in range(num_stages)]
    s_refs = [args[3 + 3 * s] for s in range(num_stages)]
    o_ref = args[1 + 3 * num_stages]

    x = x_ref[0].astype(jnp.float32)                       # (Cin0, H0*W0)

    for s in range(num_stages):
        h, w_, cin, cout = stage_dims[s]
        hw = h * w_

        # Static (row, col) index vectors for the border masks (hoisted per stage).
        pos = lax.broadcasted_iota(jnp.int32, (1, hw), 1)
        if (w_ & (w_ - 1)) == 0:                           # power-of-two fast path
            col = pos & (w_ - 1)
            row = pos >> int(round(math.log2(w_)))
        else:
            col = pos % w_
            row = pos // w_

        # im2col (transposed): pt is (9*Cin, HW); rows t*Cin:(t+1)*Cin hold tap
        # (ky,kx) = (t//3, t%3).  Conv padding=1 via lane rolls + border masks --
        # no zero-filled scratch, no narrow masked stores.
        taps = []
        for t in range(9):
            oy, ox = t // 3 - 1, t % 3 - 1
            shift = oy * w_ + ox
            tap = jnp.roll(x, -shift, axis=1) if shift != 0 else x
            valid = None
            if oy == -1:
                valid = row >= 1
            elif oy == 1:
                valid = row <= h - 2
            if ox == -1:
                c_ok = col >= 1
                valid = c_ok if valid is None else jnp.logical_and(valid, c_ok)
            elif ox == 1:
                c_ok = col <= w_ - 2
                valid = c_ok if valid is None else jnp.logical_and(valid, c_ok)
            if valid is not None:
                tap = jnp.where(valid, tap, 0.0)
            taps.append(tap)
        pt = jnp.concatenate(taps, axis=0)                 # (9*Cin, HW) f32

        # Conv + folded BN scale: one MXU matmul; M = HW sits on lanes (lane-dense).
        y = jnp.dot(w_refs[s][...], pt,
                    preferred_element_type=jnp.float32)    # (Cout, HW)
        y = y + b_refs[s][...]                             # (Cout,1) bias broadcast
        if userelu_flags[s]:
            y = jnp.maximum(y, 0.0)

        # MaxPool 2x2 stride 2 in the flat lane domain: pair-maxes via lane rolls,
        # then compress the kept lanes with a 0/1 selection matmul (idle MXU).
        y = jnp.maximum(y, jnp.roll(y, -1, axis=1))        # max over (j, j+1)
        y = jnp.maximum(y, jnp.roll(y, -w_, axis=1))       # max over (i, i+1)
        x = jnp.dot(y, s_refs[s][...],
                    preferred_element_type=jnp.float32)    # (Cout, HW/4)

    # Flatten to torch's out.view(N, -1) (NCHW channel-major) order and write one
    # lane-dense (1, Cf*Hf*Wf) row -- unmasked full-lane store.
    cf = x.shape[0]
    flat = jnp.concatenate([x[c:c + 1, :] for c in range(cf)], axis=1)
    o_ref[0] = flat.astype(o_ref.dtype)


def init_convnet_params(key, in_planes, out_planes, num_stages):
    """Matches PyTorch init: Conv ~ N(0, sqrt(2/(3*3*out))), BN gamma=1, beta=0,
    fresh running stats (mean=0, var=1); eval-mode BN folded into (scale, bias)."""
    if isinstance(out_planes, int):
        out_planes = [out_planes for _ in range(num_stages)]
    num_planes = [in_planes] + list(out_planes)
    eps = 1e-5
    params = []
    for i in range(num_stages):
        cin, cout = num_planes[i], num_planes[i + 1]
        key, sub = jax.random.split(key)
        std = math.sqrt(2.0 / (3 * 3 * cout))
        w = std * jax.random.normal(sub, (cout, cin, 3, 3), dtype=jnp.float32)  # OIHW
        gamma = jnp.ones((cout,), jnp.float32)
        beta = jnp.zeros((cout,), jnp.float32)
        running_mean = jnp.zeros((cout,), jnp.float32)
        running_var = jnp.ones((cout,), jnp.float32)
        scale = gamma / jnp.sqrt(running_var + eps)        # BN eval scale
        bias = beta - running_mean * scale                 # BN eval bias
        params.append((w, scale, bias))
    return params


def _pool_selection_matrix(h, w):
    """0/1 matrix S of shape (H*W, (H/2)*(W/2)): S[p, p'] = 1 iff p = 2i'*W + 2j'."""
    i2 = jnp.arange(h // 2, dtype=jnp.int32)
    j2 = jnp.arange(w // 2, dtype=jnp.int32)
    sel = (2 * i2[:, None] * w + 2 * j2[None, :]).reshape(-1)       # ((H/2)*(W/2),)
    return jax.nn.one_hot(sel, h * w, dtype=jnp.float32).T          # (HW, HW/4)


def convnet_forward(x_nchw, params, *, userelu_last=True):
    """Full ConvNet forward. x_nchw: (N, C, H, W) f32 -> (N, flat) in torch view order."""
    n, cin0, h0, w0 = x_nchw.shape
    num_stages = len(params)

    # Free contiguous reshape only -- no transpose, lane-dense (H*W) DMA inner dim.
    x = x_nchw.reshape(n, cin0, h0 * w0)

    stage_dims, userelu_flags = [], []
    operands = [x]
    in_specs = [pl.BlockSpec((1, cin0, h0 * w0), lambda i: (i, 0, 0))]

    h, w_, cin = h0, w0, cin0
    for i, (w, scale, bias) in enumerate(params):
        cout = w.shape[0]
        assert h % 2 == 0 and w_ % 2 == 0
        # OIHW -> (Cout, 3, 3, Cin) -> (Cout, 9*Cin); fold BN scale into the rows.
        w_t = jnp.transpose(w, (0, 2, 3, 1)).reshape(cout, 9 * cin)
        w_t = w_t * scale.reshape(cout, 1)
        s_mat = _pool_selection_matrix(h, w_)
        operands += [w_t.astype(jnp.float32),
                     bias.reshape(cout, 1).astype(jnp.float32),
                     s_mat]
        in_specs += [pl.BlockSpec((cout, 9 * cin), lambda i: (0, 0)),
                     pl.BlockSpec((cout, 1), lambda i: (0, 0)),
                     pl.BlockSpec((h * w_, (h // 2) * (w_ // 2)), lambda i: (0, 0))]
        stage_dims.append((h, w_, cin, cout))
        userelu_flags.append(True if i < num_stages - 1 else userelu_last)
        h, w_, cin = h // 2, w_ // 2, cout

    feat = cin * h * w_                                    # Cf*Hf*Wf (= 128 here)
    kernel = functools.partial(_convnet_kernel,
                               stage_dims=tuple(stage_dims),
                               userelu_flags=tuple(userelu_flags))

    y = pl.pallas_call(
        kernel,
        out_shape=jax.ShapeDtypeStruct((n, 1, feat), x_nchw.dtype),
        grid=(n,),
        in_specs=in_specs,
        out_specs=pl.BlockSpec((1, 1, feat), lambda i: (i, 0, 0)),
        compiler_params=pltpu.CompilerParams(
            dimension_semantics=("parallel",)),            # batch across v7x's 2 TCs
    )(*operands)

    return y.reshape(n, feat)


if __name__ == "__main__":
    # opt = {'in_planes': 4, 'out_planes': 8, 'num_stages': 2, 'userelu': True}
    in_planes, out_planes, num_stages, userelu = 4, 8, 2, True

    key = jax.random.PRNGKey(0)
    key, xkey = jax.random.split(key)
    x = jax.random.normal(xkey, (2, in_planes, 16, 16), dtype=jnp.float32)

    params = init_convnet_params(key, in_planes, out_planes, num_stages)

    out = jax.block_until_ready(convnet_forward(x, params, userelu_last=userelu))

    assert out.shape == (2, out_planes * (16 // (2 ** num_stages)) ** 2), out.shape
    print("KERNEL_OK")
</pallas_src>

<mosaic_0001>
module attributes {stable_mosaic.version = 11 : i64} {
  func.func @_convnet_kernel(%arg0: i32, %arg1: memref<1x4x256xf32, #tpu.memory_space<vmem>>, %arg2: memref<8x36xf32, #tpu.memory_space<vmem>>, %arg3: memref<8x1xf32, #tpu.memory_space<vmem>>, %arg4: memref<256x64xf32, #tpu.memory_space<vmem>>, %arg5: memref<8x72xf32, #tpu.memory_space<vmem>>, %arg6: memref<8x1xf32, #tpu.memory_space<vmem>>, %arg7: memref<64x16xf32, #tpu.memory_space<vmem>>, %arg8: memref<1x1x128xf32, #tpu.memory_space<vmem>>) attributes {dimension_semantics = [#tpu.dimension_semantics<parallel>], iteration_bounds = array<i64: 2>, scalar_prefetch = 0 : i64, scratch_operands = 0 : i64, tpu.core_type = #tpu.core_type<tc>, window_params = [{transform_indices = @transform_0, window_bounds = array<i64: 1, 4, 256>}, {pipeline_mode = #tpu.pipeline_mode<synchronous>, transform_indices = @transform_1, window_bounds = array<i64: 8, 36>}, {pipeline_mode = #tpu.pipeline_mode<synchronous>, transform_indices = @transform_2, window_bounds = array<i64: 8, 1>}, {pipeline_mode = #tpu.pipeline_mode<synchronous>, transform_indices = @transform_3, window_bounds = array<i64: 256, 64>}, {pipeline_mode = #tpu.pipeline_mode<synchronous>, transform_indices = @transform_4, window_bounds = array<i64: 8, 72>}, {pipeline_mode = #tpu.pipeline_mode<synchronous>, transform_indices = @transform_5, window_bounds = array<i64: 8, 1>}, {pipeline_mode = #tpu.pipeline_mode<synchronous>, transform_indices = @transform_6, window_bounds = array<i64: 64, 16>}, {transform_indices = @transform_7, window_bounds = array<i64: 1, 1, 128>}]} {
    %c0 = arith.constant 0 : index
    %c0_0 = arith.constant 0 : index
    %c0_1 = arith.constant 0 : index
    %0 = vector.load %arg1[%c0, %c0_0, %c0_1] : memref<1x4x256xf32, #tpu.memory_space<vmem>>, vector<1x4x256xf32>
    %1 = vector.shape_cast %0 : vector<1x4x256xf32> to vector<4x256xf32>
    %2 = tpu.iota {dimensions = array<i32: 1>} : vector<1x256xi32>
    %c15_i32 = arith.constant 15 : i32
    %3 = vector.broadcast %c15_i32 : i32 to vector<1x256xi32>
    %4 = arith.andi %2, %3 : vector<1x256xi32>
    %c4_i32 = arith.constant 4 : i32
    %5 = vector.broadcast %c4_i32 : i32 to vector<1x256xi32>
    %6 = arith.shrsi %2, %5 : vector<1x256xi32>
    %7 = vector.extract_strided_slice %1 {offsets = [0, 239], sizes = [4, 17], strides = [1, 1]} : vector<4x256xf32> to vector<4x17xf32>
    %8 = vector.extract_strided_slice %1 {offsets = [0, 0], sizes = [4, 239], strides = [1, 1]} : vector<4x256xf32> to vector<4x239xf32>
    %9 = tpu.concatenate %7, %8 in 1 : vector<4x17xf32>, vector<4x239xf32> -> vector<4x256xf32>
    %c1_i32 = arith.constant 1 : i32
    %10 = vector.broadcast %c1_i32 : i32 to vector<1x256xi32>
    %11 = arith.cmpi sge, %6, %10 : vector<1x256xi32>
    %c1_i32_2 = arith.constant 1 : i32
    %12 = vector.broadcast %c1_i32_2 : i32 to vector<1x256xi32>
    %13 = arith.cmpi sge, %4, %12 : vector<1x256xi32>
    %14 = arith.andi %11, %13 : vector<1x256xi1>
    %cst = arith.constant 0.000000e+00 : f32
    %15 = vector.shape_cast %14 : vector<1x256xi1> to vector<1x256xi1>
    %16 = vector.broadcast %15 : vector<1x256xi1> to vector<4x256xi1>
    %17 = vector.broadcast %cst : f32 to vector<4x256xf32>
    %18 = arith.select %16, %9, %17 : vector<4x256xi1>, vector<4x256xf32>
    %19 = vector.extract_strided_slice %1 {offsets = [0, 240], sizes = [4, 16], strides = [1, 1]} : vector<4x256xf32> to vector<4x16xf32>
    %20 = vector.extract_strided_slice %1 {offsets = [0, 0], sizes = [4, 240], strides = [1, 1]} : vector<4x256xf32> to vector<4x240xf32>
    %21 = tpu.concatenate %19, %20 in 1 : vector<4x16xf32>, vector<4x240xf32> -> vector<4x256xf32>
    %c1_i32_3 = arith.constant 1 : i32
    %22 = vector.broadcast %c1_i32_3 : i32 to vector<1x256xi32>
    %23 = arith.cmpi sge, %6, %22 : vector<1x256xi32>
    %cst_4 = arith.constant 0.000000e+00 : f32
    %24 = vector.shape_cast %23 : vector<1x256xi1> to vector<1x256xi1>
    %25 = vector.broadcast %24 : vector<1x256xi1> to vector<4x256xi1>
    %26 = vector.broadcast %cst_4 : f32 to vector<4x256xf32>
    %27 = arith.select %25, %21, %26 : vector<4x256xi1>, vector<4x256xf32>
    %28 = vector.extract_strided_slice %1 {offsets = [0, 241], sizes = [4, 15], strides = [1, 1]} : vector<4x256xf32> to vector<4x15xf32>
    %29 = vector.extract_strided_slice %1 {offsets = [0, 0], sizes = [4, 241], strides = [1, 1]} : vector<4x256xf32> to vector<4x241xf32>
    %30 = tpu.concatenate %28, %29 in 1 : vector<4x15xf32>, vector<4x241xf32> -> vector<4x256xf32>
    %c1_i32_5 = arith.constant 1 : i32
    %31 = vector.broadcast %c1_i32_5 : i32 to vector<1x256xi32>
    %32 = arith.cmpi sge, %6, %31 : vector<1x256xi32>
    %c14_i32 = arith.constant 14 : i32
    %33 = vector.broadcast %c14_i32 : i32 to vector<1x256xi32>
    %34 = arith.cmpi sle, %4, %33 : vector<1x256xi32>
    %35 = arith.andi %32, %34 : vector<1x256xi1>
    %cst_6 = arith.constant 0.000000e+00 : f32
    %36 = vector.shape_cast %35 : vector<1x256xi1> to vector<1x256xi1>
    %37 = vector.broadcast %36 : vector<1x256xi1> to vector<4x256xi1>
    %38 = vector.broadcast %cst_6 : f32 to vector<4x256xf32>
    %39 = arith.select %37, %30, %38 : vector<4x256xi1>, vector<4x256xf32>
    %40 = vector.extract_strided_slice %1 {offsets = [0, 255], sizes = [4, 1], strides = [1, 1]} : vector<4x256xf32> to vector<4x1xf32>
    %41 = vector.extract_strided_slice %1 {offsets = [0, 0], sizes = [4, 255], strides = [1, 1]} : vector<4x256xf32> to vector<4x255xf32>
    %42 = tpu.concatenate %40, %41 in 1 : vector<4x1xf32>, vector<4x255xf32> -> vector<4x256xf32>
    %c1_i32_7 = arith.constant 1 : i32
    %43 = vector.broadcast %c1_i32_7 : i32 to vector<1x256xi32>
    %44 = arith.cmpi sge, %4, %43 : vector<1x256xi32>
    %cst_8 = arith.constant 0.000000e+00 : f32
    %45 = vector.shape_cast %44 : vector<1x256xi1> to vector<1x256xi1>
    %46 = vector.broadcast %45 : vector<1x256xi1> to vector<4x256xi1>
    %47 = vector.broadcast %cst_8 : f32 to vector<4x256xf32>
    %48 = arith.select %46, %42, %47 : vector<4x256xi1>, vector<4x256xf32>
    %49 = vector.extract_strided_slice %1 {offsets = [0, 1], sizes = [4, 255], strides = [1, 1]} : vector<4x256xf32> to vector<4x255xf32>
    %50 = vector.extract_strided_slice %1 {offsets = [0, 0], sizes = [4, 1], strides = [1, 1]} : vector<4x256xf32> to vector<4x1xf32>
    %51 = tpu.concatenate %49, %50 in 1 : vector<4x255xf32>, vector<4x1xf32> -> vector<4x256xf32>
    %c14_i32_9 = arith.constant 14 : i32
    %52 = vector.broadcast %c14_i32_9 : i32 to vector<1x256xi32>
    %53 = arith.cmpi sle, %4, %52 : vector<1x256xi32>
    %cst_10 = arith.constant 0.000000e+00 : f32
    %54 = vector.shape_cast %53 : vector<1x256xi1> to vector<1x256xi1>
    %55 = vector.broadcast %54 : vector<1x256xi1> to vector<4x256xi1>
    %56 = vector.broadcast %cst_10 : f32 to vector<4x256xf32>
    %57 = arith.select %55, %51, %56 : vector<4x256xi1>, vector<4x256xf32>
    %58 = vector.extract_strided_slice %1 {offsets = [0, 15], sizes = [4, 241], strides = [1, 1]} : vector<4x256xf32> to vector<4x241xf32>
    %59 = vector.extract_strided_slice %1 {offsets = [0, 0], sizes = [4, 15], strides = [1, 1]} : vector<4x256xf32> to vector<4x15xf32>
    %60 = tpu.concatenate %58, %59 in 1 : vector<4x241xf32>, vector<4x15xf32> -> vector<4x256xf32>
    %c14_i32_11 = arith.constant 14 : i32
    %61 = vector.broadcast %c14_i32_11 : i32 to vector<1x256xi32>
    %62 = arith.cmpi sle, %6, %61 : vector<1x256xi32>
    %c1_i32_12 = arith.constant 1 : i32
    %63 = vector.broadcast %c1_i32_12 : i32 to vector<1x256xi32>
    %64 = arith.cmpi sge, %4, %63 : vector<1x256xi32>
    %65 = arith.andi %62, %64 : vector<1x256xi1>
    %cst_13 = arith.constant 0.000000e+00 : f32
    %66 = vector.shape_cast %65 : vector<1x256xi1> to vector<1x256xi1>
    %67 = vector.broadcast %66 : vector<1x256xi1> to vector<4x256xi1>
    %68 = vector.broadcast %cst_13 : f32 to vector<4x256xf32>
    %69 = arith.select %67, %60, %68 : vector<4x256xi1>, vector<4x256xf32>
    %70 = vector.extract_strided_slice %1 {offsets = [0, 16], sizes = [4, 240], strides = [1, 1]} : vector<4x256xf32> to vector<4x240xf32>
    %71 = vector.extract_strided_slice %1 {offsets = [0, 0], sizes = [4, 16], strides = [1, 1]} : vector<4x256xf32> to vector<4x16xf32>
    %72 = tpu.concatenate %70, %71 in 1 : vector<4x240xf32>, vector<4x16xf32> -> vector<4x256xf32>
    %c14_i32_14 = arith.constant 14 : i32
    %73 = vector.broadcast %c14_i32_14 : i32 to vector<1x256xi32>
    %74 = arith.cmpi sle, %6, %73 : vector<1x256xi32>
    %cst_15 = arith.constant 0.000000e+00 : f32
    %75 = vector.shape_cast %74 : vector<1x256xi1> to vector<1x256xi1>
    %76 = vector.broadcast %75 : vector<1x256xi1> to vector<4x256xi1>
    %77 = vector.broadcast %cst_15 : f32 to vector<4x256xf32>
    %78 = arith.select %76, %72, %77 : vector<4x256xi1>, vector<4x256xf32>
    %79 = vector.extract_strided_slice %1 {offsets = [0, 17], sizes = [4, 239], strides = [1, 1]} : vector<4x256xf32> to vector<4x239xf32>
    %80 = vector.extract_strided_slice %1 {offsets = [0, 0], sizes = [4, 17], strides = [1, 1]} : vector<4x256xf32> to vector<4x17xf32>
    %81 = tpu.concatenate %79, %80 in 1 : vector<4x239xf32>, vector<4x17xf32> -> vector<4x256xf32>
    %c14_i32_16 = arith.constant 14 : i32
    %82 = vector.broadcast %c14_i32_16 : i32 to vector<1x256xi32>
    %83 = arith.cmpi sle, %6, %82 : vector<1x256xi32>
    %c14_i32_17 = arith.constant 14 : i32
    %84 = vector.broadcast %c14_i32_17 : i32 to vector<1x256xi32>
    %85 = arith.cmpi sle, %4, %84 : vector<1x256xi32>
    %86 = arith.andi %83, %85 : vector<1x256xi1>
    %cst_18 = arith.constant 0.000000e+00 : f32
    %87 = vector.shape_cast %86 : vector<1x256xi1> to vector<1x256xi1>
    %88 = vector.broadcast %87 : vector<1x256xi1> to vector<4x256xi1>
    %89 = vector.broadcast %cst_18 : f32 to vector<4x256xf32>
    %90 = arith.select %88, %81, %89 : vector<4x256xi1>, vector<4x256xf32>
    %91 = tpu.concatenate %18, %27, %39, %48, %1, %57, %69, %78, %90 in 0 : vector<4x256xf32>, vector<4x256xf32>, vector<4x256xf32>, vector<4x256xf32>, vector<4x256xf32>, vector<4x256xf32>, vector<4x256xf32>, vector<4x256xf32>, vector<4x256xf32> -> vector<36x256xf32>
    %c0_19 = arith.constant 0 : index
    %c0_20 = arith.constant 0 : index
    %92 = vector.load %arg2[%c0_19, %c0_20] : memref<8x36xf32, #tpu.memory_space<vmem>>, vector<8x36xf32>
    %cst_21 = arith.constant dense<0.000000e+00> : vector<8x256xf32>
    %93 = tpu.matmul %92, %91, %cst_21 {dimension_numbers = #tpu.dot_dimension_numbers<[1], [0], [0], [1], [0, 0, 1, 1], [], []>} : vector<8x36xf32>, vector<36x256xf32>, vector<8x256xf32> -> vector<8x256xf32>
    %c0_22 = arith.constant 0 : index
    %c0_23 = arith.constant 0 : index
    %94 = vector.load %arg3[%c0_22, %c0_23] : memref<8x1xf32, #tpu.memory_space<vmem>>, vector<8x1xf32>
    %95 = vector.broadcast %94 : vector<8x1xf32> to vector<8x256xf32>
    %96 = arith.addf %93, %95 : vector<8x256xf32>
    %cst_24 = arith.constant 0.000000e+00 : f32
    %97 = vector.broadcast %cst_24 : f32 to vector<8x256xf32>
    %98 = arith.maximumf %96, %97 : vector<8x256xf32>
    %99 = vector.extract_strided_slice %98 {offsets = [0, 1], sizes = [8, 255], strides = [1, 1]} : vector<8x256xf32> to vector<8x255xf32>
    %100 = vector.extract_strided_slice %98 {offsets = [0, 0], sizes = [8, 1], strides = [1, 1]} : vector<8x256xf32> to vector<8x1xf32>
    %101 = tpu.concatenate %99, %100 in 1 : vector<8x255xf32>, vector<8x1xf32> -> vector<8x256xf32>
    %102 = arith.maximumf %98, %101 : vector<8x256xf32>
    %103 = vector.extract_strided_slice %102 {offsets = [0, 16], sizes = [8, 240], strides = [1, 1]} : vector<8x256xf32> to vector<8x240xf32>
    %104 = vector.extract_strided_slice %102 {offsets = [0, 0], sizes = [8, 16], strides = [1, 1]} : vector<8x256xf32> to vector<8x16xf32>
    %105 = tpu.concatenate %103, %104 in 1 : vector<8x240xf32>, vector<8x16xf32> -> vector<8x256xf32>
    %106 = arith.maximumf %102, %105 : vector<8x256xf32>
    %c0_25 = arith.constant 0 : index
    %c0_26 = arith.constant 0 : index
    %107 = vector.load %arg4[%c0_25, %c0_26] : memref<256x64xf32, #tpu.memory_space<vmem>>, vector<256x64xf32>
    %cst_27 = arith.constant dense<0.000000e+00> : vector<8x64xf32>
    %108 = tpu.matmul %106, %107, %cst_27 {dimension_numbers = #tpu.dot_dimension_numbers<[1], [0], [0], [1], [0, 0, 1, 1], [], []>} : vector<8x256xf32>, vector<256x64xf32>, vector<8x64xf32> -> vector<8x64xf32>
    %109 = tpu.iota {dimensions = array<i32: 1>} : vector<1x64xi32>
    %c7_i32 = arith.constant 7 : i32
    %110 = vector.broadcast %c7_i32 : i32 to vector<1x64xi32>
    %111 = arith.andi %109, %110 : vector<1x64xi32>
    %c3_i32 = arith.constant 3 : i32
    %112 = vector.broadcast %c3_i32 : i32 to vector<1x64xi32>
    %113 = arith.shrsi %109, %112 : vector<1x64xi32>
    %114 = vector.extract_strided_slice %108 {offsets = [0, 55], sizes = [8, 9], strides = [1, 1]} : vector<8x64xf32> to vector<8x9xf32>
    %115 = vector.extract_strided_slice %108 {offsets = [0, 0], sizes = [8, 55], strides = [1, 1]} : vector<8x64xf32> to vector<8x55xf32>
    %116 = tpu.concatenate %114, %115 in 1 : vector<8x9xf32>, vector<8x55xf32> -> vector<8x64xf32>
    %c1_i32_28 = arith.constant 1 : i32
    %117 = vector.broadcast %c1_i32_28 : i32 to vector<1x64xi32>
    %118 = arith.cmpi sge, %113, %117 : vector<1x64xi32>
    %c1_i32_29 = arith.constant 1 : i32
    %119 = vector.broadcast %c1_i32_29 : i32 to vector<1x64xi32>
    %120 = arith.cmpi sge, %111, %119 : vector<1x64xi32>
    %121 = arith.andi %118, %120 : vector<1x64xi1>
    %cst_30 = arith.constant 0.000000e+00 : f32
    %122 = vector.shape_cast %121 : vector<1x64xi1> to vector<1x64xi1>
    %123 = vector.broadcast %122 : vector<1x64xi1> to vector<8x64xi1>
    %124 = vector.broadcast %cst_30 : f32 to vector<8x64xf32>
    %125 = arith.select %123, %116, %124 : vector<8x64xi1>, vector<8x64xf32>
    %126 = vector.extract_strided_slice %108 {offsets = [0, 56], sizes = [8, 8], strides = [1, 1]} : vector<8x64xf32> to vector<8x8xf32>
    %127 = vector.extract_strided_slice %108 {offsets = [0, 0], sizes = [8, 56], strides = [1, 1]} : vector<8x64xf32> to vector<8x56xf32>
    %128 = tpu.concatenate %126, %127 in 1 : vector<8x8xf32>, vector<8x56xf32> -> vector<8x64xf32>
    %c1_i32_31 = arith.constant 1 : i32
    %129 = vector.broadcast %c1_i32_31 : i32 to vector<1x64xi32>
    %130 = arith.cmpi sge, %113, %129 : vector<1x64xi32>
    %cst_32 = arith.constant 0.000000e+00 : f32
    %131 = vector.shape_cast %130 : vector<1x64xi1> to vector<1x64xi1>
    %132 = vector.broadcast %131 : vector<1x64xi1> to vector<8x64xi1>
    %133 = vector.broadcast %cst_32 : f32 to vector<8x64xf32>
    %134 = arith.select %132, %128, %133 : vector<8x64xi1>, vector<8x64xf32>
    %135 = vector.extract_strided_slice %108 {offsets = [0, 57], sizes = [8, 7], strides = [1, 1]} : vector<8x64xf32> to vector<8x7xf32>
    %136 = vector.extract_strided_slice %108 {offsets = [0, 0], sizes = [8, 57], strides = [1, 1]} : vector<8x64xf32> to vector<8x57xf32>
    %137 = tpu.concatenate %135, %136 in 1 : vector<8x7xf32>, vector<8x57xf32> -> vector<8x64xf32>
    %c1_i32_33 = arith.constant 1 : i32
    %138 = vector.broadcast %c1_i32_33 : i32 to vector<1x64xi32>
    %139 = arith.cmpi sge, %113, %138 : vector<1x64xi32>
    %c6_i32 = arith.constant 6 : i32
    %140 = vector.broadcast %c6_i32 : i32 to vector<1x64xi32>
    %141 = arith.cmpi sle, %111, %140 : vector<1x64xi32>
    %142 = arith.andi %139, %141 : vector<1x64xi1>
    %cst_34 = arith.constant 0.000000e+00 : f32
    %143 = vector.shape_cast %142 : vector<1x64xi1> to vector<1x64xi1>
    %144 = vector.broadcast %143 : vector<1x64xi1> to vector<8x64xi1>
    %145 = vector.broadcast %cst_34 : f32 to vector<8x64xf32>
    %146 = arith.select %144, %137, %145 : vector<8x64xi1>, vector<8x64xf32>
    %147 = vector.extract_strided_slice %108 {offsets = [0, 63], sizes = [8, 1], strides = [1, 1]} : vector<8x64xf32> to vector<8x1xf32>
    %148 = vector.extract_strided_slice %108 {offsets = [0, 0], sizes = [8, 63], strides = [1, 1]} : vector<8x64xf32> to vector<8x63xf32>
    %149 = tpu.concatenate %147, %148 in 1 : vector<8x1xf32>, vector<8x63xf32> -> vector<8x64xf32>
    %c1_i32_35 = arith.constant 1 : i32
    %150 = vector.broadcast %c1_i32_35 : i32 to vector<1x64xi32>
    %151 = arith.cmpi sge, %111, %150 : vector<1x64xi32>
    %cst_36 = arith.constant 0.000000e+00 : f32
    %152 = vector.shape_cast %151 : vector<1x64xi1> to vector<1x64xi1>
    %153 = vector.broadcast %152 : vector<1x64xi1> to vector<8x64xi1>
    %154 = vector.broadcast %cst_36 : f32 to vector<8x64xf32>
    %155 = arith.select %153, %149, %154 : vector<8x64xi1>, vector<8x64xf32>
    %156 = vector.extract_strided_slice %108 {offsets = [0, 1], sizes = [8, 63], strides = [1, 1]} : vector<8x64xf32> to vector<8x63xf32>
    %157 = vector.extract_strided_slice %108 {offsets = [0, 0], sizes = [8, 1], strides = [1, 1]} : vector<8x64xf32> to vector<8x1xf32>
    %158 = tpu.concatenate %156, %157 in 1 : vector<8x63xf32>, vector<8x1xf32> -> vector<8x64xf32>
    %c6_i32_37 = arith.constant 6 : i32
    %159 = vector.broadcast %c6_i32_37 : i32 to vector<1x64xi32>
    %160 = arith.cmpi sle, %111, %159 : vector<1x64xi32>
    %cst_38 = arith.constant 0.000000e+00 : f32
    %161 = vector.shape_cast %160 : vector<1x64xi1> to vector<1x64xi1>
    %162 = vector.broadcast %161 : vector<1x64xi1> to vector<8x64xi1>
    %163 = vector.broadcast %cst_38 : f32 to vector<8x64xf32>
    %164 = arith.select %162, %158, %163 : vector<8x64xi1>, vector<8x64xf32>
    %165 = vector.extract_strided_slice %108 {offsets = [0, 7], sizes = [8, 57], strides = [1, 1]} : vector<8x64xf32> to vector<8x57xf32>
    %166 = vector.extract_strided_slice %108 {offsets = [0, 0], sizes = [8, 7], strides = [1, 1]} : vector<8x64xf32> to vector<8x7xf32>
    %167 = tpu.concatenate %165, %166 in 1 : vector<8x57xf32>, vector<8x7xf32> -> vector<8x64xf32>
    %c6_i32_39 = arith.constant 6 : i32
    %168 = vector.broadcast %c6_i32_39 : i32 to vector<1x64xi32>
    %169 = arith.cmpi sle, %113, %168 : vector<1x64xi32>
    %c1_i32_40 = arith.constant 1 : i32
    %170 = vector.broadcast %c1_i32_40 : i32 to vector<1x64xi32>
    %171 = arith.cmpi sge, %111, %170 : vector<1x64xi32>
    %172 = arith.andi %169, %171 : vector<1x64xi1>
    %cst_41 = arith.constant 0.000000e+00 : f32
    %173 = vector.shape_cast %172 : vector<1x64xi1> to vector<1x64xi1>
    %174 = vector.broadcast %173 : vector<1x64xi1> to vector<8x64xi1>
    %175 = vector.broadcast %cst_41 : f32 to vector<8x64xf32>
    %176 = arith.select %174, %167, %175 : vector<8x64xi1>, vector<8x64xf32>
    %177 = vector.extract_strided_slice %108 {offsets = [0, 8], sizes = [8, 56], strides = [1, 1]} : vector<8x64xf32> to vector<8x56xf32>
    %178 = vector.extract_strided_slice %108 {offsets = [0, 0], sizes = [8, 8], strides = [1, 1]} : vector<8x64xf32> to vector<8x8xf32>
    %179 = tpu.concatenate %177, %178 in 1 : vector<8x56xf32>, vector<8x8xf32> -> vector<8x64xf32>
    %c6_i32_42 = arith.constant 6 : i32
    %180 = vector.broadcast %c6_i32_42 : i32 to vector<1x64xi32>
    %181 = arith.cmpi sle, %113, %180 : vector<1x64xi32>
    %cst_43 = arith.constant 0.000000e+00 : f32
    %182 = vector.shape_cast %181 : vector<1x64xi1> to vector<1x64xi1>
    %183 = vector.broadcast %182 : vector<1x64xi1> to vector<8x64xi1>
    %184 = vector.broadcast %cst_43 : f32 to vector<8x64xf32>
    %185 = arith.select %183, %179, %184 : vector<8x64xi1>, vector<8x64xf32>
    %186 = vector.extract_strided_slice %108 {offsets = [0, 9], sizes = [8, 55], strides = [1, 1]} : vector<8x64xf32> to vector<8x55xf32>
    %187 = vector.extract_strided_slice %108 {offsets = [0, 0], sizes = [8, 9], strides = [1, 1]} : vector<8x64xf32> to vector<8x9xf32>
    %188 = tpu.concatenate %186, %187 in 1 : vector<8x55xf32>, vector<8x9xf32> -> vector<8x64xf32>
    %c6_i32_44 = arith.constant 6 : i32
    %189 = vector.broadcast %c6_i32_44 : i32 to vector<1x64xi32>
    %190 = arith.cmpi sle, %113, %189 : vector<1x64xi32>
    %c6_i32_45 = arith.constant 6 : i32
    %191 = vector.broadcast %c6_i32_45 : i32 to vector<1x64xi32>
    %192 = arith.cmpi sle, %111, %191 : vector<1x64xi32>
    %193 = arith.andi %190, %192 : vector<1x64xi1>
    %cst_46 = arith.constant 0.000000e+00 : f32
    %194 = vector.shape_cast %193 : vector<1x64xi1> to vector<1x64xi1>
    %195 = vector.broadcast %194 : vector<1x64xi1> to vector<8x64xi1>
    %196 = vector.broadcast %cst_46 : f32 to vector<8x64xf32>
    %197 = arith.select %195, %188, %196 : vector<8x64xi1>, vector<8x64xf32>
    %198 = tpu.concatenate %125, %134, %146, %155, %108, %164, %176, %185, %197 in 0 : vector<8x64xf32>, vector<8x64xf32>, vector<8x64xf32>, vector<8x64xf32>, vector<8x64xf32>, vector<8x64xf32>, vector<8x64xf32>, vector<8x64xf32>, vector<8x64xf32> -> vector<72x64xf32>
    %c0_47 = arith.constant 0 : index
    %c0_48 = arith.constant 0 : index
    %199 = vector.load %arg5[%c0_47, %c0_48] : memref<8x72xf32, #tpu.memory_space<vmem>>, vector<8x72xf32>
    %cst_49 = arith.constant dense<0.000000e+00> : vector<8x64xf32>
    %200 = tpu.matmul %199, %198, %cst_49 {dimension_numbers = #tpu.dot_dimension_numbers<[1], [0], [0], [1], [0, 0, 1, 1], [], []>} : vector<8x72xf32>, vector<72x64xf32>, vector<8x64xf32> -> vector<8x64xf32>
    %c0_50 = arith.constant 0 : index
    %c0_51 = arith.constant 0 : index
    %201 = vector.load %arg6[%c0_50, %c0_51] : memref<8x1xf32, #tpu.memory_space<vmem>>, vector<8x1xf32>
    %202 = vector.broadcast %201 : vector<8x1xf32> to vector<8x64xf32>
    %203 = arith.addf %200, %202 : vector<8x64xf32>
    %cst_52 = arith.constant 0.000000e+00 : f32
    %204 = vector.broadcast %cst_52 : f32 to vector<8x64xf32>
    %205 = arith.maximumf %203, %204 : vector<8x64xf32>
    %206 = vector.extract_strided_slice %205 {offsets = [0, 1], sizes = [8, 63], strides = [1, 1]} : vector<8x64xf32> to vector<8x63xf32>
    %207 = vector.extract_strided_slice %205 {offsets = [0, 0], sizes = [8, 1], strides = [1, 1]} : vector<8x64xf32> to vector<8x1xf32>
    %208 = tpu.concatenate %206, %207 in 1 : vector<8x63xf32>, vector<8x1xf32> -> vector<8x64xf32>
    %209 = arith.maximumf %205, %208 : vector<8x64xf32>
    %210 = vector.extract_strided_slice %209 {offsets = [0, 8], sizes = [8, 56], strides = [1, 1]} : vector<8x64xf32> to vector<8x56xf32>
    %211 = vector.extract_strided_slice %209 {offsets = [0, 0], sizes = [8, 8], strides = [1, 1]} : vector<8x64xf32> to vector<8x8xf32>
    %212 = tpu.concatenate %210, %211 in 1 : vector<8x56xf32>, vector<8x8xf32> -> vector<8x64xf32>
    %213 = arith.maximumf %209, %212 : vector<8x64xf32>
    %c0_53 = arith.constant 0 : index
    %c0_54 = arith.constant 0 : index
    %214 = vector.load %arg7[%c0_53, %c0_54] : memref<64x16xf32, #tpu.memory_space<vmem>>, vector<64x16xf32>
    %cst_55 = arith.constant dense<0.000000e+00> : vector<8x16xf32>
    %215 = tpu.matmul %213, %214, %cst_55 {dimension_numbers = #tpu.dot_dimension_numbers<[1], [0], [0], [1], [0, 0, 1, 1], [], []>} : vector<8x64xf32>, vector<64x16xf32>, vector<8x16xf32> -> vector<8x16xf32>
    %216 = vector.extract_strided_slice %215 {offsets = [0, 0], sizes = [1, 16], strides = [1, 1]} : vector<8x16xf32> to vector<1x16xf32>
    %217 = vector.extract_strided_slice %215 {offsets = [1, 0], sizes = [1, 16], strides = [1, 1]} : vector<8x16xf32> to vector<1x16xf32>
    %218 = vector.extract_strided_slice %215 {offsets = [2, 0], sizes = [1, 16], strides = [1, 1]} : vector<8x16xf32> to vector<1x16xf32>
    %219 = vector.extract_strided_slice %215 {offsets = [3, 0], sizes = [1, 16], strides = [1, 1]} : vector<8x16xf32> to vector<1x16xf32>
    %220 = vector.extract_strided_slice %215 {offsets = [4, 0], sizes = [1, 16], strides = [1, 1]} : vector<8x16xf32> to vector<1x16xf32>
    %221 = vector.extract_strided_slice %215 {offsets = [5, 0], sizes = [1, 16], strides = [1, 1]} : vector<8x16xf32> to vector<1x16xf32>
    %222 = vector.extract_strided_slice %215 {offsets = [6, 0], sizes = [1, 16], strides = [1, 1]} : vector<8x16xf32> to vector<1x16xf32>
    %223 = vector.extract_strided_slice %215 {offsets = [7, 0], sizes = [1, 16], strides = [1, 1]} : vector<8x16xf32> to vector<1x16xf32>
    %224 = tpu.concatenate %216, %217, %218, %219, %220, %221, %222, %223 in 1 : vector<1x16xf32>, vector<1x16xf32>, vector<1x16xf32>, vector<1x16xf32>, vector<1x16xf32>, vector<1x16xf32>, vector<1x16xf32>, vector<1x16xf32> -> vector<1x128xf32>
    %c0_56 = arith.constant 0 : index
    %c0_57 = arith.constant 0 : index
    %c0_58 = arith.constant 0 : index
    %225 = vector.load %arg8[%c0_56, %c0_57, %c0_58] : memref<1x1x128xf32, #tpu.memory_space<vmem>>, vector<1x1x128xf32>
    %226 = vector.shape_cast %225 : vector<1x1x128xf32> to vector<1x128xf32>
    %227 = vector.shape_cast %224 : vector<1x128xf32> to vector<1x1x128xf32>
    tpu.vector_store %arg8[%c0_56, %c0_57, %c0_58], %227 {strides = array<i32>} : memref<1x1x128xf32, #tpu.memory_space<vmem>>, vector<1x1x128xf32>,
    return
  }
  func.func @transform_0(%arg0: i32) -> (i32, i32, i32) {
    %c0_i32 = arith.constant 0 : i32
    %c0_i32_0 = arith.constant 0 : i32
    %c0_i32_1 = arith.constant 0 : i32
    return %arg0, %c0_i32, %c0_i32_0 : i32, i32, i32
  }
  func.func @transform_1(%arg0: i32) -> (i32, i32) {
    %c0_i32 = arith.constant 0 : i32
    %c0_i32_0 = arith.constant 0 : i32
    %c0_i32_1 = arith.constant 0 : i32
    return %c0_i32, %c0_i32_0 : i32, i32
  }
  func.func @transform_2(%arg0: i32) -> (i32, i32) {
    %c0_i32 = arith.constant 0 : i32
    %c0_i32_0 = arith.constant 0 : i32
    %c0_i32_1 = arith.constant 0 : i32
    return %c0_i32, %c0_i32_0 : i32, i32
  }
  func.func @transform_3(%arg0: i32) -> (i32, i32) {
    %c0_i32 = arith.constant 0 : i32
    %c0_i32_0 = arith.constant 0 : i32
    %c0_i32_1 = arith.constant 0 : i32
    return %c0_i32, %c0_i32_0 : i32, i32
  }
  func.func @transform_4(%arg0: i32) -> (i32, i32) {
    %c0_i32 = arith.constant 0 : i32
    %c0_i32_0 = arith.constant 0 : i32
    %c0_i32_1 = arith.constant 0 : i32
    return %c0_i32, %c0_i32_0 : i32, i32
  }
  func.func @transform_5(%arg0: i32) -> (i32, i32) {
    %c0_i32 = arith.constant 0 : i32
    %c0_i32_0 = arith.constant 0 : i32
    %c0_i32_1 = arith.constant 0 : i32
    return %c0_i32, %c0_i32_0 : i32, i32
  }
  func.func @transform_6(%arg0: i32) -> (i32, i32) {
    %c0_i32 = arith.constant 0 : i32
    %c0_i32_0 = arith.constant 0 : i32
    %c0_i32_1 = arith.constant 0 : i32
    return %c0_i32, %c0_i32_0 : i32, i32
  }
  func.func @transform_7(%arg0: i32) -> (i32, i32, i32) {
    %c0_i32 = arith.constant 0 : i32
    %c0_i32_0 = arith.constant 0 : i32
    %c0_i32_1 = arith.constant 0 : i32
    return %arg0, %c0_i32, %c0_i32_0 : i32, i32, i32
  }
}

</mosaic_0001>

<bundles_post_ra>
// kernel: tpu_custom_call.1
= control target key start
LH: loop header
LB: loop body
LE: loop exit
PB: predicated region body
PF: predicated region fallthrough
CT: control target
= control target key end

     0   :  { %12 = vsyncpa [#allocation3], 0  ;;  %s1899_s0 = inlined_call_operand.vmem [shape: f32[2,4,256], index: 0, kind: input, shape index: {}]   ;;  %s1900_s1 = inlined_call_operand.vmem [shape: f32[8,36], index: 1, kind: input, shape index: {}]   ;;  %s1901_s2 = inlined_call_operand.vmem [shape: f32[8,1], index: 2, kind: input, shape index: {}]   ;;  %s1902_s3 = inlined_call_operand.vmem [shape: f32[256,64], index: 3, kind: input, shape index: {}]   ;;  %s1903_s4 = inlined_call_operand.vmem [shape: f32[8,72], index: 4, kind: input, shape index: {}]   ;;  %s1904_s5 = inlined_call_operand.vmem [shape: f32[8,1], index: 5, kind: input, shape index: {}]   ;;  %s1905_s6 = inlined_call_operand.vmem [shape: f32[64,16], index: 6, kind: input, shape index: {}]   ;;  %s1906_s7 = inlined_call_operand.hbm [shape: f32[2,1,128], index: 7, kind: output, shape index: {}]  }
   0x1   :  { %14 = vsyncpa [#allocation3 + $0x1], 0  ;;  %s1402_s24 = smov 0   ;;  %s1404_s25 = smov 0  }
   0x2   :  { %s1406_s26 = smov 0   ;;  %s1408_s27 = smov 0  }
   0x3 LB: > { %s1423_s28 = sadd.s32 4294967295, %s1329_s27   ;;  %s1071_s29 = sadd.s32 4294967294, %s1329_s27   ;;  %s1329_s27 = sphi %s1408_s27, %s1936_s27   ;;  %s1325_s26 = sphi %s1406_s26, %s1935_s26   ;;  %s1321_s25 = sphi %s1404_s25, %s1934_s25   ;;  %s1317_s24 = sphi %s1402_s24, %s1933_s24  }
   0x4   : > { %s1427_s30 = sadd.s32 1, %s1329_s27   ;;  %s179_s8 = sadd.s32 1, %s1325_s26 }
   0x5   : > { %s176_s9 = ssub.s32 %s1329_s27, %s1427_s30  ;;  %p189_p0 = scmp.ne.s32.totalorder %s1325_s26, %s1321_s25 }
   0x6   : > { %p177_p1 = scmp.eq.s32.totalorder %s176_s9, 0  ;;  %p190_p2 = scmp.eq.s32.totalorder %s1423_s28, 1 }
   0x7   : > { %p195_p3 = scmp.ne.s32.totalorder %s1321_s25, %s1317_s24  ;;  %p196_p4 = scmp.eq.s32.totalorder %s1071_s29, 1 }
   0x8   : > { %s1438_s10 = scalar_select %p177_p1, %s1325_s26, %s179_s8  }
   0x9   : > { %p1440_p5 = por %p190_p2, %p189_p0  ;;  %p1444_p6 = por %p196_p4, %p195_p3 }
   0xa   : > { %p1074_p7 = scmp.ge.s32.totalorder %s1329_s27, 1  ;;  %p240_p8 = scmp.lt.s32.totalorder %s1329_s27, 3 }
   0xc   : > { %p241_p9 = pnand %p1074_p7, %p240_p8 }
   0xd   : > { %p271_p10 = scmp.lt.s32.totalorder (!%p241_p9), %s1423_s28, 1  ;;  %s1331_s18 = smov (!%p241_p9), 111  }
   0xe   : > { %244 = sbr.rel (%p241_p9) target bundleno = 1727 (0x6bf), region = 48  ;;  %s1332_s19 = smov (!%p241_p9), 112  }
   0xf   : > { %s1333_s20 = smov (!%p241_p9), 127   ;;  %s1334_s21 = smov (!%p241_p9), 113  }
  0x10   : > { %s1335_s22 = smov (!%p241_p9), 1   ;;  %s1337_s23 = smov (!%p241_p9), 16  }
  0x11   : > { %s1339_s29 = smov (!%p241_p9), 15   ;;  %s1340_s8 = smov (!%p241_p9), 17  }
  0x12   : > { %s1343_s9 = smov (!%p241_p9), 56   ;;  %s1346_s15 = smov (!%p241_p9), 121  }
  0x13   : > { %s272_s13 = scalar_select %p271_p10, %s1423_s28, 1  ;;  %v1336_v2 = vmov 0.0   ;;  %v1338_v3 = vmov 0   ;;  %v465_v4 = vld [vmem:[%s1901_s2] sm:$0xff]  ;;  %v277_v5 = vlaneseq  ;;  %vm416_vm4 = vcmask 908288   ;;  %v583_v56 = vld [vmem:[%s1902_s3 + $0x18] sm:$0xff] }
  0x14   : > { %545 = vmatprep.mubr.f32.mxu1 %v1336_v2  ;;  %1148 = vmatprep.subr.mxu0 %v1336_v2  ;;  %vm455_vm7 = vcmask 1043456   ;;  %vm364_vm8 = vcmask 1039360   ;;  %vm400_vm9 = vcmask 916480   ;;  %vm380_vm12 = vcmask 924672   ;;  %v597_v59 = vld [vmem:[%s1902_s3 + $0x88] sm:$0xff]  ;;  %s1347_s16 = smov 63  }
  0x15   : > { %s1093_s14 = sshll.u32 %s272_s13, 3  ;;  %1257 = vset.pattern.permute.xlu0 %v1338_v3  ;;  %v1490_v6 = vand.u32 127, %v277_v5  ;;  %vm349_vm15 = vcmask 7168   ;;  %s1344_s13 = smov 120  }
  0x16   : > { %s275_s17 = scalar_lea.vmem %s1899_s0, %s1093_s14  ;;  %s1345_s14 = smov 57  }
  0x17   : > { %v1455_v0 = vld [vmem:[%s275_s17] sm:$0xff]  ;;  %v1493_v7 = vadd.s32 128, %v1490_v6  ;;  %v280_v8 = vand.u32 15, %v1490_v6  ;;  %v282_v9 = vshra.s32 %v1490_v6, 4  ;;  %s1348_s17 = smov 65  }
  0x18   : > { %412 = vrot.lane.b32.xlu1 %v1455_v0, %s1331_s18  ;;  %396 = vrot.lane.b32.xlu0 %v1455_v0, %s1332_s19  ;;  %v1462_v1 = vcombine.high %v1455_v0, %v1455_v0 }
  0x19   : > { %v281_v10 = vand.u32 15, %v1493_v7  ;;  %v283_v11 = vshra.s32 %v1493_v7, 4  ;;  %vm1499_vm0 = vcmp.le.s32.totalorder %v280_v8, 14  ;;  %vm1505_vm1 = vcmp.le.s32.totalorder %v282_v9, 14 }
  0x1a   : > { %vm422_vm5 = vmand %vm1505_vm1, %vm1499_vm0  ;;  %vm1528_vm10 = vcmp.ge.s32.totalorder %v280_v8, 1 }
  0x1b   : > { %vm1509_vm2 = vcmp.le.s32.totalorder %v281_v10, 14  ;;  %vm1515_vm3 = vcmp.le.s32.totalorder %v283_v11, 14  ;;  %vm1533_vm11 = vcmp.ge.s32.totalorder %v281_v10, 1  ;;  %vm388_vm13 = vmand %vm1505_vm1, %vm1528_vm10 }
  0x1c   : > { %360 = vrot.lane.b32.xlu0 %v1455_v0, %s1333_s20  ;;  %414 = vrot.lane.b32.xlu1 %v1462_v1, %s1331_s18  ;;  %vm423_vm6 = vmand %vm1515_vm3, %vm1509_vm2  ;;  %s1350_s18 = smov 7  }
  0x1d   : > { %vm389_vm14 = vmand %vm1515_vm3, %vm1533_vm11 }
  0x20   : > { %362 = vrot.lane.b32.xlu1 %v1462_v1, %s1333_s20  ;;  %398 = vrot.lane.b32.xlu0 %v1462_v1, %s1332_s19 }
  0x24   : > { %378 = vrot.lane.b32.xlu1 %v1462_v1, %s1334_s21  ;;  %376 = vrot.lane.b32.xlu0 %v1455_v0, %s1334_s21  ;;  %s1351_s21 = smov 71  }
  0x28   : > { %347 = vrot.lane.b32.xlu1 %v1455_v0, %s1335_s22  ;;  %344 = vrot.lane.b32.xlu0 %v1462_v1, %s1335_s22 }
  0x2c   : > { %311 = vrot.lane.b32.xlu1 %v1455_v0, %s1337_s23  ;;  %308 = vrot.lane.b32.xlu0 %v1462_v1, %s1337_s23 }
  0x30   : > { %327 = vrot.lane.b32.xlu1 %v1455_v0, %s1339_s29  ;;  %324 = vrot.lane.b32.xlu0 %v1462_v1, %s1339_s29  ;;  %s1341_s29 = smov 55  }
  0x34   : > { %289 = vrot.lane.b32.xlu1 %v1455_v0, %s1340_s8  ;;  %286 = vrot.lane.b32.xlu0 %v1462_v1, %s1340_s8  ;;  %s1342_s8 = smov 119  }
  0x38   : > { %468 = vperm.xlu0 %1257, %v465_v4  }
  0x8a   : > { %v413_v14 = vpop.permute.xlu1 %412  ;;  %v397_v15 = vpop.permute.xlu0 %396 }
  0x8e   : > { %v361_v18 = vpop.permute.xlu0 %360  ;;  %v415_v19 = vpop.permute.xlu1 %414 }
  0x8f   : > { %v417_v20 = vsel %vm416_vm4, %v413_v14, %v415_v19  ;;  %v421_v21 = vsel %vm416_vm4, %v415_v19, %v413_v14  ;;  %vm1577_vm4 = vcmp.ge.s32.totalorder %v283_v11, 1 }
  0x90   : > { %v429_v22 = vsel %vm423_vm6, %v421_v21, 0.0  ;;  %v428_v23 = vsel %vm422_vm5, %v417_v20, 0.0  ;;  %vm329_vm5 = vcmask 121856  }
  0x91   : > { %1077 = vmatprep.subr.msk.mxu1 %vm455_vm7, %v429_v22  ;;  %v464_v22 = vld [vmem:[%s1900_s1] sm:$0xff] }
  0x92   : > { %1078 = vmatpush1.msk.msra.mxu1 %vm455_vm7, %v428_v23  ;;  %v363_v25 = vpop.permute.xlu1 %362  ;;  %v399_v26 = vpop.permute.xlu0 %398 }
  0x93   : > { %v365_v28 = vsel %vm364_vm8, %v361_v18, %v363_v25  ;;  %v369_v29 = vsel %vm364_vm8, %v363_v25, %v361_v18  ;;  %v401_v30 = vsel %vm400_vm9, %v397_v15, %v399_v26  ;;  %v405_v31 = vsel %vm400_vm9, %v399_v26, %v397_v15 }
  0x94   : > { %v375_v32 = vsel %vm1509_vm2, %v369_v29, 0.0  ;;  %v410_v33 = vsel %vm1505_vm1, %v401_v30, 0.0  ;;  %v411_v34 = vsel %vm1515_vm3, %v405_v31, 0.0  ;;  %v374_v35 = vsel %vm1499_vm0, %v365_v28, 0.0  ;;  %v611_v28 = vld [vmem:[%s1902_s3 + $0xf8] sm:$0xff]  ;;  %v610_v30 = vld [vmem:[%s1902_s3 + $0xf0] sm:$0xff] }
  0x95   : > { %v446_v36 = vrot.slane %v375_v32, 4  ;;  %v451_v39 = vrot.slane %v410_v33, 4  ;;  %v452_v40 = vrot.slane %v411_v34, 4  ;;  %v445_v43 = vrot.slane %v374_v35, 4  ;;  %v595_v29 = vld [vmem:[%s1902_s3 + $0x78] sm:$0xff]  ;;  %v594_v31 = vld [vmem:[%s1902_s3 + $0x70] sm:$0xff] }
  0x96   : > { %v379_v37 = vpop.permute.xlu1 %378  ;;  %v377_v38 = vpop.permute.xlu0 %376  ;;  %vm313_vm1 = vcmask 130048   ;;  %vm1567_vm3 = vcmp.ge.s32.totalorder %v282_v9, 1  ;;  %v609_v34 = vld [vmem:[%s1902_s3 + $0xe8] sm:$0xff] }
  0x97   : > { %v381_v41 = vsel %vm380_vm12, %v377_v38, %v379_v37  ;;  %v385_v42 = vsel %vm380_vm12, %v379_v37, %v377_v38  ;;  %v461_v50 = vsel %vm455_vm7, %v1462_v1, %v446_v36  ;;  %v460_v51 = vsel %vm455_vm7, %v1455_v0, %v445_v43  ;;  %vm336_vm6 = vmand %vm1567_vm3, %vm1499_vm0  ;;  %v593_v35 = vld [vmem:[%s1902_s3 + $0x68] sm:$0xff]  ;;  %v608_v37 = vld [vmem:[%s1902_s3 + $0xe0] sm:$0xff] }
  0x98   : > { %v394_v44 = vsel %vm388_vm13, %v381_v41, 0.0  ;;  %v395_v45 = vsel %vm389_vm14, %v385_v42, 0.0  ;;  %vm337_vm12 = vmand %vm1577_vm4, %vm1509_vm2  ;;  %vm291_vm13 = vcmask 138240   ;;  %v592_v38 = vld [vmem:[%s1902_s3 + $0x60] sm:$0xff]  ;;  %v606_v41 = vld [vmem:[%s1902_s3 + $0xd0] sm:$0xff]  ;;  %vm774_vm14 = vcmask 449536  }
  0x99   : > { %v463_v46 = vsel %vm455_vm7, %v395_v45, %v452_v40  ;;  %v462_v47 = vsel %vm455_vm7, %v394_v44, %v451_v39  ;;  %vm300_vm0 = vmand %vm1567_vm3, %vm1528_vm10  ;;  %v607_v39 = vld [vmem:[%s1902_s3 + $0xd8] sm:$0xff]  ;;  %v590_v42 = vld [vmem:[%s1902_s3 + $0x50] sm:$0xff] }
  0x9a   : > { %v348_v48 = vpop.permute.xlu1 %347  ;;  %505 = vmatprep.subr.mxu1 %v463_v46  ;;  %v345_v49 = vpop.permute.xlu0 %344  ;;  %vm301_vm2 = vmand %vm1577_vm4, %vm1533_vm11  ;;  %v591_v40 = vld [vmem:[%s1902_s3 + $0x58] sm:$0xff]  ;;  %v605_v43 = vld [vmem:[%s1902_s3 + $0xc8] sm:$0xff] }
  0x9b   : > { %506 = vmatpush1.msra.mxu1 %v462_v47  ;;  %v350_v52 = vsel %vm349_vm15, %v348_v48, %v345_v49  ;;  %v353_v53 = vsel %vm349_vm15, %v345_v49, %v348_v48  ;;  %v589_v44 = vld [vmem:[%s1902_s3 + $0x48] sm:$0xff]  ;;  %v604_v45 = vld [vmem:[%s1902_s3 + $0xc0] sm:$0xff]  ;;  %v603_v47 = vld [vmem:[%s1902_s3 + $0xb8] sm:$0xff] }
  0x9c   : > { %507 = vmatprep.subr.mxu1 %v461_v50  ;;  %v358_v57 = vsel %vm1528_vm10, %v353_v53, 0.0  ;;  %v359_v58 = vsel %vm1533_vm11, %v350_v52, 0.0  ;;  %vm471_vm10 = vcmask 293888   ;;  %v588_v46 = vld [vmem:[%s1902_s3 + $0x40] sm:$0xff]  ;;  %v587_v48 = vld [vmem:[%s1902_s3 + $0x38] sm:$0xff]  ;;  %v602_v49 = vld [vmem:[%s1902_s3 + $0xb0] sm:$0xff] }
  0x9d   : > { %508 = vmatpush1.msra.mxu1 %v460_v51  ;;  %v438_v0 = vrot.slane %v358_v57, 4  ;;  %v439_v1 = vrot.slane %v359_v58, 4  ;;  %v586_v50 = vld [vmem:[%s1902_s3 + $0x30] sm:$0xff]  ;;  %v601_v51 = vld [vmem:[%s1902_s3 + $0xa8] sm:$0xff]  ;;  %v600_v53 = vld [vmem:[%s1902_s3 + $0xa0] sm:$0xff] }
  0x9e   : > { %v312_v54 = vpop.permute.xlu1 %311  ;;  %v309_v55 = vpop.permute.xlu0 %308  ;;  %v585_v52 = vld [vmem:[%s1902_s3 + $0x28] sm:$0xff]  ;;  %v598_v57 = vld [vmem:[%s1902_s3 + $0x90] sm:$0xff] }
  0x9f   : > { %v314_v60 = vsel %vm313_vm1, %v312_v54, %v309_v55  ;;  %v317_v61 = vsel %vm313_vm1, %v309_v55, %v312_v54  ;;  %v584_v54 = vld [vmem:[%s1902_s3 + $0x20] sm:$0xff]  ;;  %v599_v55 = vld [vmem:[%s1902_s3 + $0x98] sm:$0xff]  ;;  %v582_v58 = vld [vmem:[%s1902_s3 + $0x10] sm:$0xff] }
  0xa0   : > { %v322_v5 = vsel %vm1567_vm3, %v317_v61, 0.0  ;;  %v323_v7 = vsel %vm1577_vm4, %v314_v60, 0.0  ;;  %v581_v60 = vld [vmem:[%s1902_s3 + $0x8] sm:$0xff]  ;;  %v596_v61 = vld [vmem:[%s1902_s3 + $0x80] sm:$0xff]  ;;  %vm763_vm4 = vcmask 457728  }
  0xa1   : > { %v432_v14 = vrot.slane %v322_v5, 4  ;;  %v433_v15 = vrot.slane %v323_v7, 4 }
  0xa2   : > { %v328_v62 = vpop.permute.xlu1 %327  ;;  %v325_v63 = vpop.permute.xlu0 %324 }
  0xa3   : > { %v330_v3 = vsel %vm329_vm5, %v328_v62, %v325_v63  ;;  %v333_v4 = vsel %vm329_vm5, %v325_v63, %v328_v62  ;;  %v580_v62 = vld [vmem:[%s1902_s3] sm:$0xff] }
  0xa4   : > { %v342_v8 = vsel %vm336_vm6, %v333_v4, 0.0  ;;  %v343_v9 = vsel %vm337_vm12, %v330_v3, 0.0  ;;  %vm750_vm6 = vcmask 465920  }
  0xa5   : > { %v459_v10 = vsel %vm455_vm7, %v343_v9, %v439_v1  ;;  %v458_v11 = vsel %vm455_vm7, %v342_v8, %v438_v0 }
  0xa6   : > { %v290_v12 = vpop.permute.xlu1 %289  ;;  %509 = vmatprep.subr.mxu1 %v459_v10  ;;  %v287_v13 = vpop.permute.xlu0 %286 }
  0xa7   : > { %v292_v16 = vsel %vm291_vm13, %v290_v12, %v287_v13  ;;  %v295_v17 = vsel %vm291_vm13, %v287_v13, %v290_v12  ;;  %510 = vmatpush1.msra.mxu1 %v458_v11  ;;  %vm739_vm13 = vcmask 515072  }
  0xa8   : > { %v306_v18 = vsel %vm300_vm0, %v295_v17, 0.0  ;;  %v307_v19 = vsel %vm301_vm2, %v292_v16, 0.0  ;;  %vm716_vm2 = vcmask 56320  }
  0xa9   : > { %v457_v20 = vsel %vm455_vm7, %v307_v19, %v433_v15  ;;  %v456_v21 = vsel %vm455_vm7, %v306_v18, %v432_v14  ;;  %vm1349_vm7 = vmmov 0   ;;  %v781_v19 = vld [vmem:[%s1904_s5] sm:$0xff] }
  0xaa   : > { %511 = vmatprep.subr.mxu1 %v457_v20  ;;  %1166 = vmatprep.mubr.msk.f32.mxu0 %vm1349_vm7, %v1336_v2  ;;  %v682_v20 = vand.u32 7, %v1490_v6 }
  0xab   : > { %512 = vmatpush1.msra.mxu1 %v456_v21  ;;  %v683_v21 = vshra.s32 %v1490_v6, 3 }
  0xac   : > { %1079 = vmatmul.mubr.msk.f32.vlgmr.msra.gmra.mxu1 %vm471_vm10, %v464_v22  ;;  %1094 = vmatprep.subr.mxu1 %v611_v28  ;;  %vm1771_vm5 = vcmp.ge.s32.totalorder %v682_v20, 1 }
  0xad   : > { %1095 = vmatpush3.msra.mxu1 %v595_v29  ;;  %vm1762_vm11 = vcmp.le.s32.totalorder %v683_v21, 6  ;;  %vm1789_vm0 = vcmp.ge.s32.totalorder %v683_v21, 1 }
  0xae   : > { %1096 = vmatprep.subr.mxu1 %v610_v30  ;;  %vm753_vm12 = vmand %vm1762_vm11, %vm1771_vm5 }
  0xaf   : > { %1097 = vmatpush3.msra.mxu1 %v594_v31 }
  0xb0   : > { %1098 = vmatprep.subr.mxu1 %v609_v34 }
  0xb1   : > { %1099 = vmatpush3.msra.mxu1 %v593_v35 }
  0xb2   : > { %1100 = vmatprep.subr.mxu1 %v608_v37 }
  0xb3   : > { %v469_v23 = vpop.permute.xlu0 %468  ;;  %1101 = vmatpush3.msra.mxu1 %v592_v38 }
  0xb4   : > { %1102 = vmatprep.subr.mxu1 %v607_v39 }
  0xb5   : > { %1103 = vmatpush3.msra.mxu1 %v591_v40 }
  0xb6   : > { %1104 = vmatprep.subr.mxu1 %v606_v41 }
  0xb7   : > { %1105 = vmatpush3.msra.mxu1 %v590_v42 }
  0xb8   : > { %1106 = vmatprep.subr.mxu1 %v605_v43 }
  0xb9   : > { %1107 = vmatpush3.msra.mxu1 %v589_v44 }
  0xba   : > { %1108 = vmatprep.subr.mxu1 %v604_v45 }
  0xbb   : > { %1109 = vmatpush3.msra.mxu1 %v588_v46 }
  0xbc   : > { %1110 = vmatprep.subr.mxu1 %v603_v47 }
  0xbd   : > { %1111 = vmatpush3.msra.mxu1 %v587_v48  ;;  %v780_v48 = vld [vmem:[%s1903_s4] sm:$0xff] }
  0xbe   : > { %1112 = vmatprep.subr.mxu1 %v602_v49 }
  0xbf   : > { %1113 = vmatpush3.msra.mxu1 %v586_v50  ;;  %v887_v50 = vld [vmem:[%s1905_s6 + $0x38] sm:$0xff] }
  0xc0   : > { %1114 = vmatprep.subr.mxu1 %v601_v51  ;;  %v886_v51 = vld [vmem:[%s1905_s6 + $0x30] sm:$0xff] }
  0xc1   : > { %1115 = vmatpush3.msra.mxu1 %v585_v52  ;;  %v885_v52 = vld [vmem:[%s1905_s6 + $0x28] sm:$0xff] }
  0xc2   : > { %1116 = vmatprep.subr.mxu1 %v600_v53  ;;  %v884_v53 = vld [vmem:[%s1905_s6 + $0x20] sm:$0xff] }
  0xc3   : > { %1117 = vmatpush3.msra.mxu1 %v584_v54 }
  0xc4   : > { %1118 = vmatprep.subr.mxu1 %v599_v55 }
  0xc5   : > { %1119 = vmatpush3.msra.mxu1 %v583_v56 }
  0xc6   : > { %1120 = vmatprep.subr.mxu1 %v598_v57  ;;  %v883_v57 = vld [vmem:[%s1905_s6 + $0x18] sm:$0xff] }
  0xc7   : > { %1121 = vmatpush3.msra.mxu1 %v582_v58 }
  0xc8   : > { %1122 = vmatprep.subr.mxu1 %v597_v59 }
  0xc9   : > { %1123 = vmatpush3.msra.mxu1 %v581_v60  ;;  %v882_v60 = vld [vmem:[%s1905_s6 + $0x10] sm:$0xff] }
  0xca   : > { %1124 = vmatprep.subr.mxu1 %v596_v61  ;;  %v881_v61 = vld [vmem:[%s1905_s6 + $0x8] sm:$0xff] }
  0xcb   : > { %1125 = vmatpush3.msra.mxu1 %v580_v62  ;;  %v880_v62 = vld [vmem:[%s1905_s6] sm:$0xff] }
 0x16c   : > { %v547_v24 = vpop.f32.mrf.mxu1 }
 0x16d   : > { %v1612_v25 = vadd.f32 %v547_v24, %v469_v23 }
 0x16e   : > { %v549_v26 = vpop.f32.mrf.mxu1 }
 0x16f   : > { %v1614_v27 = vadd.f32 %v549_v26, %v469_v23  ;;  %v552_v32 = vmax.f32 %v1612_v25, 0.0 }
 0x171   : > { %v553_v33 = vmax.f32 %v1614_v27, 0.0 }
 0x173   : > { %v1258_v36 = vpack.i.bf16 %v553_v33, %v552_v32 }
 0x175   : > { %1259 = vrot.lane.b32.xlu1 %v1258_v36, %s1333_s20 }
 0x1e7   : > { %v1260_v63 = vpop.permute.xlu1 %1259 }
 0x1e8   : > { %v1262_v0 = vunpack.i.h.bf16 %v1260_v63  ;;  %v1261_v1 = vunpack.i.l.bf16 %v1260_v63 }
 0x1ea   : > { %v560_v3 = vsel %vm364_vm8, %v1261_v1, %v1262_v0  ;;  %v564_v4 = vsel %vm364_vm8, %v1262_v0, %v1261_v1  ;;  %vm1758_vm8 = vcmp.le.s32.totalorder %v682_v20, 6 }
 0x1eb   : > { %v565_v5 = vmax.f32 %v552_v32, %v560_v3  ;;  %v566_v7 = vmax.f32 %v553_v33, %v564_v4  ;;  %vm776_vm3 = vmand %vm1762_vm11, %vm1758_vm8 }
 0x1ec   : > { %vm719_vm10 = vmand %vm1789_vm0, %vm1758_vm8 }
 0x1ed   : > { %v1263_v8 = vpack.i.bf16 %v566_v7, %v565_v5 }
 0x1ef   : > { %1264 = vrot.lane.b32.xlu1 %v1263_v8, %s1332_s19 }
 0x261   : > { %v1265_v9 = vpop.permute.xlu1 %1264 }
 0x262   : > { %v1267_v10 = vunpack.i.h.bf16 %v1265_v9  ;;  %v1266_v11 = vunpack.i.l.bf16 %v1265_v9 }
 0x264   : > { %v573_v12 = vsel %vm400_vm9, %v1266_v11, %v1267_v10  ;;  %v577_v13 = vsel %vm400_vm9, %v1267_v10, %v1266_v11 }
 0x265   : > { %v578_v14 = vmax.f32 %v565_v5, %v573_v12  ;;  %v579_v15 = vmax.f32 %v566_v7, %v577_v13 }
 0x267   : > { %676 = vmatprep.mubr.f32.mxu1 %v579_v15 }
 0x268   : > { %677 = vmatmul.mubr.f32.vlgmr.msra.gmra.mxu1 %v578_v14 }
 0x328   : > { %v1126_v16 = vpop.f32.mrf.mxu1 }
 0x32a   : > { %v1127_v17 = vpop.f32.mrf.mxu1 }
 0x32b   : > { %v1728_v18 = vadd.f32 %v1127_v17, %v1126_v16 }
 0x32d   : > { %771 = vrot.lane.b32.xlu1 %v1728_v18, %s1341_s29  ;;  %768 = vrot.lane.b32.xlu0 %v1728_v18, %s1342_s8  ;;  %s1352_s29 = smov 8   ;;  %s1353_s8 = smov 72  }
 0x331   : > { %760 = vrot.lane.b32.xlu1 %v1728_v18, %s1343_s9  ;;  %757 = vrot.lane.b32.xlu0 %v1728_v18, %s1344_s13 }
 0x335   : > { %747 = vrot.lane.b32.xlu1 %v1728_v18, %s1345_s14  ;;  %744 = vrot.lane.b32.xlu0 %v1728_v18, %s1346_s15  ;;  %s1355_s14 = smov 73  }
 0x339   : > { %736 = vrot.lane.b32.xlu1 %v1728_v18, %s1347_s16  ;;  %733 = vrot.lane.b32.xlu0 %v1728_v18, %s1333_s20 }
 0x33d   : > { %726 = vrot.lane.b32.xlu1 %v1728_v18, %s1335_s22  ;;  %723 = vrot.lane.b32.xlu0 %v1728_v18, %s1348_s17  ;;  %s1354_s22 = smov 9  }
 0x341   : > { %713 = vrot.lane.b32.xlu1 %v1728_v18, %s1350_s18  ;;  %710 = vrot.lane.b32.xlu0 %v1728_v18, %s1351_s21 }
 0x345   : > { %702 = vrot.lane.b32.xlu1 %v1728_v18, %s1352_s29  ;;  %699 = vrot.lane.b32.xlu0 %v1728_v18, %s1353_s8  ;;  %s1360_s29 = smov 80  }
 0x349   : > { %688 = vrot.lane.b32.xlu1 %v1728_v18, %s1354_s22  ;;  %685 = vrot.lane.b32.xlu0 %v1728_v18, %s1355_s14 }
 0x34d   : > { %784 = vperm.xlu0 %1257, %v781_v19  }
 0x39f   : > { %v772_v24 = vpop.permute.xlu1 %771  ;;  %v769_v25 = vpop.permute.xlu0 %768 }
 0x3a0   : > { %v775_v26 = vsel %vm774_vm14, %v769_v25, %v772_v24  ;;  %vm787_vm14 = vcmask 588800  }
 0x3a1   : > { %1149 = vmatpush3.msk.msra.mxu0 %vm776_vm3, %v775_v26  ;;  %vm992_vm3 = vcmask 261120  }
 0x3a2   : > { %1150 = vmatprep.subr.mxu0 %v1336_v2 }
 0x3a3   : > { %v761_v6 = vpop.permute.xlu1 %760  ;;  %v758_v27 = vpop.permute.xlu0 %757 }
 0x3a4   : > { %v764_v29 = vsel %vm763_vm4, %v758_v27, %v761_v6 }
 0x3a5   : > { %1151 = vmatpush3.msk.msra.mxu0 %vm1762_vm11, %v764_v29  ;;  %vm705_vm11 = vcmask 64512  }
 0x3a6   : > { %1152 = vmatprep.subr.mxu0 %v1336_v2 }
 0x3a7   : > { %v748_v30 = vpop.permute.xlu1 %747  ;;  %v745_v31 = vpop.permute.xlu0 %744 }
 0x3a8   : > { %v751_v32 = vsel %vm750_vm6, %v745_v31, %v748_v30  ;;  %vm999_vm6 = vcmask 785408  }
 0x3a9   : > { %1153 = vmatpush3.msk.msra.mxu0 %vm753_vm12, %v751_v32 }
 0x3aa   : > { %1154 = vmatprep.subr.mxu0 %v1336_v2 }
 0x3ab   : > { %v737_v33 = vpop.permute.xlu1 %736  ;;  %v734_v34 = vpop.permute.xlu0 %733 }
 0x3ac   : > { %v740_v35 = vsel %vm739_vm13, %v734_v34, %v737_v33 }
 0x3ad   : > { %1155 = vmatpush3.msk.msra.mxu0 %vm1758_vm8, %v740_v35  ;;  %vm695_vm8 = vmand %vm1789_vm0, %vm1771_vm5 }
 0x3ae   : > { %1156 = vmatprep.subr.mxu0 %v1336_v2 }
 0x3af   : > { %v727_v36 = vpop.permute.xlu1 %726  ;;  %1157 = vmatpush3.msra.mxu0 %v1728_v18  ;;  %v724_v37 = vpop.permute.xlu0 %723 }
 0x3b0   : > { %v729_v39 = vsel %vm349_vm15, %v724_v37, %v727_v36  ;;  %1158 = vmatprep.subr.mxu0 %v1336_v2  ;;  %vm691_vm15 = vcmask 72704  }
 0x3b1   : > { %1159 = vmatpush3.msk.msra.mxu0 %vm1771_vm5, %v729_v39  ;;  %vm997_vm5 = vcmask 654336  }
 0x3b2   : > { %1160 = vmatprep.subr.mxu0 %v1336_v2 }
 0x3b3   : > { %v714_v40 = vpop.permute.xlu1 %713  ;;  %v711_v41 = vpop.permute.xlu0 %710 }
 0x3b4   : > { %v717_v42 = vsel %vm716_vm2, %v711_v41, %v714_v40 }
 0x3b5   : > { %1161 = vmatpush3.msk.msra.mxu0 %vm719_vm10, %v717_v42 }
 0x3b6   : > { %1162 = vmatprep.subr.mxu0 %v1336_v2 }
 0x3b7   : > { %v703_v43 = vpop.permute.xlu1 %702  ;;  %v700_v44 = vpop.permute.xlu0 %699 }
 0x3b8   : > { %v706_v45 = vsel %vm705_vm11, %v700_v44, %v703_v43 }
 0x3b9   : > { %1163 = vmatpush3.msk.msra.mxu0 %vm1789_vm0, %v706_v45 }
 0x3ba   : > { %1164 = vmatprep.subr.mxu0 %v1336_v2 }
 0x3bb   : > { %v689_v46 = vpop.permute.xlu1 %688  ;;  %v686_v47 = vpop.permute.xlu0 %685 }
 0x3bc   : > { %v692_v49 = vsel %vm691_vm15, %v686_v47, %v689_v46 }
 0x3bd   : > { %1165 = vmatpush3.msk.msra.mxu0 %vm695_vm8, %v692_v49 }
 0x3be   : > { %1167 = vmatmul.mubr.msk.f32.vlgmr.msra.gmra.mxu0 %vm787_vm14, %v780_v48  ;;  %1169 = vmatprep.subr.mxu0 %v1336_v2 }
 0x3bf   : > { %1185 = vmatprep.mubr.msk.f32.mxu0 %vm1349_vm7, %v1336_v2  ;;  %1170 = vmatpush3.msra.mxu0 %v887_v50  ;;  %vm888_vm7 = vcmask 523264  }
 0x3c0   : > { %1171 = vmatprep.subr.mxu0 %v1336_v2 }
 0x3c1   : > { %1172 = vmatpush3.msra.mxu0 %v886_v51 }
 0x3c2   : > { %1173 = vmatprep.subr.mxu0 %v1336_v2 }
 0x3c3   : > { %1174 = vmatpush3.msra.mxu0 %v885_v52 }
 0x3c4   : > { %1175 = vmatprep.subr.mxu0 %v1336_v2 }
 0x3c5   : > { %1176 = vmatpush3.msra.mxu0 %v884_v53 }
 0x3c6   : > { %1177 = vmatprep.subr.mxu0 %v1336_v2 }
 0x3c7   : > { %1178 = vmatpush3.msra.mxu0 %v883_v57 }
 0x3c8   : > { %v785_v54 = vpop.permute.xlu0 %784  ;;  %1179 = vmatprep.subr.mxu0 %v1336_v2 }
 0x3c9   : > { %1180 = vmatpush3.msra.mxu0 %v882_v60 }
 0x3ca   : > { %1181 = vmatprep.subr.mxu0 %v1336_v2 }
 0x3cb   : > { %1182 = vmatpush3.msra.mxu0 %v881_v61 }
 0x3cc   : > { %1183 = vmatprep.subr.mxu0 %v1336_v2 }
 0x3cd   : > { %1184 = vmatpush3.msra.mxu0 %v880_v62 }
 0x47e   : > { %v857_v55 = vpop.f32.mrf.mxu0 }
 0x47f   : > { %v858_v56 = vadd.f32 %v857_v55, %v785_v54 }
 0x480   : > { %v1168_v58 = vpop.f32.mrf.mxu0 }
 0x481   : > { %v861_v59 = vmax.f32 %v858_v56, 0.0 }
 0x483   : > { %866 = vrot.lane.b32.xlu0 %v861_v59, %s1347_s16  ;;  %863 = vrot.lane.b32.xlu1 %v861_v59, %s1333_s20  ;;  %s1356_s20 = smov 32   ;;  %s1359_s16 = smov 96  }
 0x4f5   : > { %v867_v63 = vpop.permute.xlu0 %866  ;;  %v864_v0 = vpop.permute.xlu1 %863 }
 0x4f6   : > { %v869_v1 = vsel %vm739_vm13, %v864_v0, %v867_v63 }
 0x4f7   : > { %v870_v3 = vmax.f32 %v861_v59, %v869_v1 }
 0x4f9   : > { %875 = vrot.lane.b32.xlu0 %v870_v3, %s1343_s9  ;;  %872 = vrot.lane.b32.xlu1 %v870_v3, %s1344_s13  ;;  %s1357_s9 = smov 64   ;;  %s1358_s13 = smov 48  }
 0x56b   : > { %v876_v4 = vpop.permute.xlu0 %875  ;;  %v873_v5 = vpop.permute.xlu1 %872 }
 0x56c   : > { %v878_v7 = vsel %vm763_vm4, %v873_v5, %v876_v4  ;;  %vm994_vm4 = vcmask 392192  }
 0x56d   : > { %v879_v2 = vmax.f32 %v870_v3, %v878_v7 }
 0x56f   : > { %1186 = vmatmul.mubr.msk.f32.vlgmr.msra.gmra.mxu0 %vm888_vm7, %v879_v2 }
 0x62f   : > { %v958_v8 = vpop.f32.mrf.mxu0 }
 0x630   : > { %v967_v9 = vrot.slane %v958_v8, 2  ;;  %v963_v10 = vrot.slane %v958_v8, 1  ;;  %v975_v12 = vrot.slane %v958_v8, 4  ;;  %v971_v13 = vrot.slane %v958_v8, 3 }
 0x631   : > { %v1187_v11 = vpop.f32.mrf.mxu0  ;;  %v983_v14 = vrot.slane %v958_v8, 6  ;;  %v979_v15 = vrot.slane %v958_v8, 5  ;;  %v987_v16 = vrot.slane %v958_v8, 7 }
 0x632   : > { %968 = vrot.lane.b32.xlu0 %v967_v9, %s1356_s20  ;;  %964 = vrot.lane.b32.xlu1 %v963_v10, %s1337_s23  ;;  %s269_s23 = sand.u32 1, %s1321_s25  }
 0x633   : > { %s270_s8 = scalar_lea.vmem [#allocation2], %s269_s23  ;;  %s1004_s18 = scalar_lea.sflag [#allocation3], %s269_s23 }
 0x634   : > { %s1016_s22 = sshll.u32 %s270_s8, 4  ;;  %s1017_s22 = int_to_ptr.vmem [resolvable:$true] %s1016_s22 }
 0x635   : > { %s1269_s21 = scalar_lea.vmem %s1017_s22, 16 }
 0x636   : > { %976 = vrot.lane.b32.xlu0 %v975_v12, %s1357_s9  ;;  %972 = vrot.lane.b32.xlu1 %v971_v13, %s1358_s13  ;;  %p1270_p11 = scmp.ne.s32.totalorder %s1017_s22, %s1269_s21 }
 0x638   : > { %p1271_p12 = pnand %p1270_p11, %p1440_p5 }
 0x63a   : > { %984 = vrot.lane.b32.xlu0 %v983_v14, %s1359_s16  ;;  %980 = vrot.lane.b32.xlu1 %v979_v15, %s1360_s29  ;;  %p1272_p13 = pneg %p1271_p12 }
 0x63e   : > { %988 = vrot.lane.b32.xlu1 %v987_v16, %s1332_s19  ;;  %s1090_s19 = sshll.u32 %s1423_s28, 4  ;;  %s1361_s28 = smov [#allocation2]  }
 0x63f   : > { %s1863_s17 = scalar_lea.hbm %s1906_s7, %s1090_s19  ;;  %s1273_s20 = sshll.u32 %s1361_s28, 4  ;;  %s1274_s20 = int_to_ptr.vmem [resolvable:$false] %s1273_s20 }
 0x640   : > { %s1275_s9 = scalar_lea.vmem %s1274_s20, 32  ;;  %p1276_p0 = scmp.lt.s32.totalorder %s1017_s22, %s1274_s20 }
 0x641   : > { %p1277_p1 = scmp.lt.s32.totalorder %s1275_s9, %s1269_s21 }
 0x643   : > { %p1278_p2 = por %p1277_p1, %p1276_p0 }
 0x645   : > { %p1279_p3 = pnand %p1278_p2, %p1272_p13 }
 0x6a4   : > { %v969_v17 = vpop.permute.xlu0 %968  ;;  %v965_v18 = vpop.permute.xlu1 %964 }
 0x6a5   : > { %v991_v19 = vsel %vm313_vm1, %v958_v8, %v965_v18 }
 0x6a6   : > { %v993_v21 = vsel %vm992_vm3, %v991_v19, %v969_v17 }
 0x6a8   : > { %v977_v20 = vpop.permute.xlu0 %976  ;;  %v973_v22 = vpop.permute.xlu1 %972 }
 0x6a9   : > { %v995_v23 = vsel %vm994_vm4, %v993_v21, %v973_v22 }
 0x6aa   : > { %v996_v24 = vsel %vm888_vm7, %v995_v23, %v977_v20 }
 0x6ac   : > { %v981_v25 = vpop.permute.xlu1 %980  ;;  %v985_v26 = vpop.permute.xlu0 %984 }
 0x6ad   : > { %v998_v6 = vsel %vm997_vm5, %v996_v24, %v981_v25 }
 0x6ae   : > { %v1000_v27 = vsel %vm999_vm6, %v998_v6, %v985_v26 }
 0x6b0   : > { %v989_v28 = vpop.permute.xlu1 %988 }
 0x6b1   : > { %v1001_v29 = vsel %vm400_vm9, %v1000_v27, %v989_v28 }
 0x6b2   : > { %1002 = vst [vmem:[%s270_s8] sm:$0x1] %v1001_v29 }
 0x6b3   : > { %1282 = shalt.err (!%p1279_p3)
}
 0x6b4   : > { %s1283_s13 = scalar_lea.hbm %s1863_s17, 16  ;;  %s1287_s23 = scalar_lea.hbm %s1906_s7, 32 }
 0x6b5   : > { %p1284_p4 = scmp.ne.s32.totalorder %s1863_s17, %s1283_s13  ;;  %p1288_p9 = scmp.lt.s32.totalorder %s1863_s17, %s1906_s7 }
 0x6b6   : > { %p1289_p10 = scmp.lt.s32.totalorder %s1287_s23, %s1283_s13 }
 0x6b7   : > { %p1285_p7 = pnand %p1284_p4, %p1440_p5 }
 0x6b8   : > { %p1290_p11 = por %p1289_p10, %p1288_p9 }
 0x6b9   : > { %p1286_p8 = pneg %p1285_p7 }
 0x6bb   : > { %p1291_p12 = pnand %p1290_p11, %p1286_p8 }
 0x6bd   : > { %1294 = shalt.err (!%p1291_p12)
}
 0x6be   : > { %1188 = dma.vmem_to_hbm [thread:$0]  (%p1440_p5), %s1017_s22, 16, %s1863_s17, %s1004_s18  }
 0x6bf PF: > { %p1194_p13 = scmp.ge.s32.totalorder %s1329_s27, 2  ;;  %s1028_s14 = sand.u32 1, %s1317_s24  }
 0x6c0   : > { %s1029_s15 = scalar_lea.sflag [#allocation3], %s1028_s14 }
 0x6c1   : > { %p1191_p0 = pnand %p1194_p13, %p1444_p6 }
 0x6c3   : > { %p1192_p1 = pneg %p1191_p0 }
 0x6c5   : > { %1312 = dma.done.wait (%p1192_p1), %s1029_s15, 16  }
 0x6c6   : > { %1314 = vsyncadd (%p1192_p1), %s1029_s15, 4294967280  ;;  %p17_p2 = scmp.ge.s32.totalorder %s1427_s30, 4   ;;  %s1933_s24 = smov %s1321_s25 }
 0x6c7   : > { %s1934_s25 = smov %s1325_s26  ;;  %s1935_s26 = smov %s1438_s10 }
 0x6c8   : > { %s1936_s27 = smov %s1427_s30  ;;  %19 = sbr.rel (!%p17_p2) target bundleno = 3 (0x3), region = 83 }
 0x6cd   :  { %1033 = vsyncpa [#allocation3], 1 }
 0x6ce   :  { %1035 = vsyncpa [#allocation3 + $0x1], 1 }

</bundles_post_ra>
